<compile_context>
chip_gen: v7x
topology: tpu7x:2x2x1
jax: 0.10.0
libtpu: 0.0.40
codegen_flags: <defaults>
</compile_context>

<pallas_src>
import jax
import jax.numpy as jnp
from jax import lax
from jax.experimental import pallas as pl
from jax.experimental.pallas import tpu as pltpu


# ---------------------------------------------------------------------------
# Wrapper-side constant builders (tiny, pure-JAX; feed the fused kernel).
# ---------------------------------------------------------------------------
def _banded_conv_weight(w, width):
    """Banded (Toeplitz) form of a 3x3 SAME conv along W for lane-dense slabs.

    w: (3, 3, Cin, Cout) HWIO.  Returns B of shape (3, width*Cin, width*Cout)
    such that for an activation slab A of shape (rows, width*Cin) (pixel-major
    channel interleave per image row):
        conv_out = tap(-1) @ B[0] + A @ B[1] + tap(+1) @ B[2]
    where tap(+-1) is the row-shifted slab (H halo).  The W halo is implicit
    in the band structure (out-of-range taps have no row in B).
    """
    kh, kw, cin, cout = w.shape
    win = jnp.arange(width)[None, :, None]                 # input pixel
    wout = jnp.arange(width)[None, None, :]                # output pixel
    kx = jnp.arange(kw)[:, None, None]
    band = (win == wout + kx - 1).astype(jnp.float32)      # (3, width, width)
    b = jnp.einsum("xpq,yxio->ypiqo", band, w.astype(jnp.float32))
    return b.reshape(kh, width * cin, width * cout)


def _block_diag(eye_b, mat):
    """Block-diagonal replication of `mat` over the batch-block dimension."""
    b = eye_b.shape[0]
    r, c = mat.shape
    return jnp.einsum("ij,ab->iajb", eye_b, mat).reshape(b * r, b * c)


def _pool_upsample_mats(H, W, C, B, dtype):
    """0/1 matrices (bf16-exact) for MaxPool2d(2) and nearest-x2 upsampling on
    batch-stacked lane-dense (B*H, W*C) slabs."""
    H2, W2 = H // 2, W // 2
    f32 = jnp.float32
    eye_c = jnp.eye(C, dtype=f32)
    eye_b = jnp.eye(B, dtype=f32)
    w_idx, w2_idx = jnp.arange(W), jnp.arange(W2)
    h_idx, h2_idx = jnp.arange(H), jnp.arange(H2)

    # Width pool: merged [even | odd] column selection, (W*C, 2*W2*C).
    sel_e = (w_idx[:, None] == 2 * w2_idx[None, :]).astype(f32)
    sel_o = (w_idx[:, None] == 2 * w2_idx[None, :] + 1).astype(f32)
    swe = jnp.einsum("ab,cd->acbd", sel_e, eye_c).reshape(W * C, W2 * C)
    swo = jnp.einsum("ab,cd->acbd", sel_o, eye_c).reshape(W * C, W2 * C)
    swcat = jnp.concatenate([swe, swo], axis=1)

    # Height pool: even-row selector, block-diagonal over the batch block.
    she = (h_idx[None, :] == 2 * h2_idx[:, None]).astype(f32)   # (H2, H)
    she_blk = _block_diag(eye_b, she)                           # (B*H2, B*H)

    # Nearest-x2 upsample: row replication (block-diag) + column replication.
    rh = (h_idx[:, None] // 2 == h2_idx[None, :]).astype(f32)   # (H, H2)
    rh_blk = _block_diag(eye_b, rh)                             # (B*H, B*H2)
    rep = (w2_idx[:, None] == w_idx[None, :] // 2).astype(f32)  # (W2, W)
    rw = jnp.einsum("ab,cd->acbd", rep, eye_c).reshape(W2 * C, W * C)

    return (swcat.astype(dtype), she_blk.astype(dtype),
            rh_blk.astype(dtype), rw.astype(dtype))


def _pick_batch_block(N, H, target_rows=256):
    """Largest divisor of N with B*H <= target_rows (MXU M-fill) and B*H a
    multiple of 8 (sublane-aligned second-minor block dim)."""
    cands = [b for b in range(1, N + 1)
             if N % b == 0 and b * H <= max(target_rows, H) and (b * H) % 8 == 0]
    return max(cands) if cands else N


# ---------------------------------------------------------------------------
# Fused kernel body (static dims captured in closure).
# ---------------------------------------------------------------------------
def _make_kernel(B, H, W, Cin, C, Cout):
    H2, W2 = H // 2, W // 2
    R, R2 = B * H, B * H2
    W2C = W2 * C
    f32, bf16 = jnp.float32, jnp.bfloat16

    def conv3(slab, w_ref, top_ok, bot_ok, acc=None):
        # 3x3 SAME conv on a batch-stacked lane-dense slab:
        # row halo via XLU rolls + per-image boundary mask (exact),
        # width halo via 3 banded MXU matmuls (bf16 operands, f32 accumulate).
        r = slab.shape[0]
        up = jnp.where(top_ok, pltpu.roll(slab, shift=1, axis=0),
                       jnp.zeros_like(slab))                 # row h-1
        dn = jnp.where(bot_ok, pltpu.roll(slab, shift=r - 1, axis=0),
                       jnp.zeros_like(slab))                 # row h+1
        taps = (up, slab, dn)
        for ky in range(3):
            term = jnp.dot(taps[ky].astype(bf16), w_ref[ky],
                           preferred_element_type=f32)
            acc = term if acc is None else acc + term
        return acc

    def kernel(x_ref, blw_ref, blb_ref, btw_ref, btb_ref, brw_ref, brb_ref,
               swcat_ref, she_ref, rh_ref, rw_ref, o_ref, a_scr):
        # Per-image row-boundary masks for the H halo of the stacked slab.
        row = lax.broadcasted_iota(jnp.int32, (R, 1), 0)
        top_ok = (row % H) != 0
        bot_ok = (row % H) != (H - 1)
        row2 = lax.broadcasted_iota(jnp.int32, (R2, 1), 0)
        top2_ok = (row2 % H2) != 0
        bot2_ok = (row2 % H2) != (H2 - 1)

        x0 = x_ref[...].astype(f32)                          # (R, W*Cin)

        # x = self.l(x): Conv3x3 + ReLU; stage skip connection in VMEM scratch.
        a = jnp.maximum(conv3(x0, blw_ref, top_ok, bot_ok) + blb_ref[...], 0.0)
        a_scr[...] = a

        # y = self.u(x): MaxPool2d(2).
        # Width: one merged [even|odd] selection matmul + VPU max of halves.
        p = jnp.dot(a.astype(bf16), swcat_ref[...], preferred_element_type=f32)
        mw = jnp.maximum(p[:, :W2C], p[:, W2C:])             # (R, W2*C)
        # Height: pair-max with the next row (roll; wrap row is never an even
        # row, so it is never selected) + even-row selection matmul.
        pairmax = jnp.maximum(mw, pltpu.roll(mw, shift=R - 1, axis=0))
        pooled = jnp.dot(she_ref[...], pairmax.astype(bf16),
                         preferred_element_type=f32)         # (R2, W2*C)

        # y = self.t(y): Conv3x3 + ReLU at half resolution.
        t = jnp.maximum(conv3(pooled, btw_ref, top2_ok, bot2_ok) + btb_ref[...],
                        0.0)

        # y = self.d(y): nearest-x2 upsample (row then column replication).
        yr = jnp.dot(rh_ref[...], t.astype(bf16), preferred_element_type=f32)
        y_up = jnp.dot(yr.astype(bf16), rw_ref[...], preferred_element_type=f32)

        # y = cat([y, x], 1); return self.r(y):
        # lane-concat -> single K = 2*W*C banded conv (fills the 256-wide MXU).
        cat = jnp.concatenate([y_up, a_scr[...]], axis=1)    # (R, 2*W*C)
        out = jnp.maximum(conv3(cat, brw_ref, top_ok, bot_ok) + brb_ref[...],
                          0.0)                               # (R, W*Cout)
        o_ref[...] = out.astype(o_ref.dtype)

    return kernel


# ---------------------------------------------------------------------------
# Forward passes.
# ---------------------------------------------------------------------------
def ubuilder_cat_forward_nhwc(x_nhwc, params, *, target_rows=256):
    """Fused UBuilderCat forward on NHWC input (no HBM transpose passes)."""
    wl, bl = params["left"]      # Conv3x3(Cin->C)+ReLU
    wt, bt = params["top"]       # Conv3x3(C->C)+ReLU
    wr, br = params["right"]     # Conv3x3(2C->Cout)+ReLU (after cat([y, x]))

    N, H, W, Cin = x_nhwc.shape
    C = wl.shape[-1]
    Cout = wr.shape[-1]
    if H % 2 or W % 2:
        # MaxPool2d(2) floors odd sizes and the later cat would mismatch in
        # the PyTorch module too; require even H, W.
        raise ValueError("UBuilderCat Pallas kernel requires even H and W")
    H2, W2 = H // 2, W // 2
    dt = x_nhwc.dtype
    f32, bf16 = jnp.float32, jnp.bfloat16

    B = _pick_batch_block(N, H, target_rows)
    R = B * H

    # bf16 MXU operands (0/1 masks are bf16-exact; learned weights lossy),
    # f32 biases added post-accumulation.
    blw = _banded_conv_weight(wl, W).astype(bf16)                  # (3, W*Cin, W*C)
    btw = _banded_conv_weight(wt, W2).astype(bf16)                 # (3, W2*C, W2*C)
    brw = jnp.concatenate([_banded_conv_weight(wr[:, :, :C, :], W),
                           _banded_conv_weight(wr[:, :, C:, :], W)],
                          axis=1).astype(bf16)                     # (3, 2*W*C, W*Cout)
    blb = jnp.tile(jnp.reshape(bl, (1, C)), (1, W)).astype(f32)    # (1, W*C)
    btb = jnp.tile(jnp.reshape(bt, (1, C)), (1, W2)).astype(f32)   # (1, W2*C)
    brb = jnp.tile(jnp.reshape(br, (1, Cout)), (1, W)).astype(f32)  # (1, W*Cout)
    swcat, she_blk, rh_blk, rw = _pool_upsample_mats(H, W, C, B, bf16)

    x_slab = x_nhwc.reshape(N * H, W * Cin)          # pure reshape, no copy

    consts = (blw, blb, btw, btb, brw, brb, swcat, she_blk, rh_blk, rw)

    def const_spec(arr):
        zeros = (0,) * arr.ndim
        return pl.BlockSpec(arr.shape, lambda n, _z=zeros: _z)

    kernel = _make_kernel(B, H, W, Cin, C, Cout)

    out_slab = pl.pallas_call(
        kernel,
        out_shape=jax.ShapeDtypeStruct((N * H, W * Cout), dt),
        grid=(N // B,),
        in_specs=[pl.BlockSpec((R, W * Cin), lambda n: (n, 0))]
                 + [const_spec(c) for c in consts],
        out_specs=pl.BlockSpec((R, W * Cout), lambda n: (n, 0)),
        scratch_shapes=[pltpu.VMEM((R, W * C), jnp.float32)],   # skip conn `a`
        compiler_params=pltpu.CompilerParams(
            dimension_semantics=("parallel",)),
    )(x_slab, *consts)

    return out_slab.reshape(N, H, W, Cout)


def ubuilder_cat_forward(x_nchw, params, *, target_rows=256):
    """NCHW (PyTorch-layout) wrapper.  In an NHWC end-to-end model, call
    ubuilder_cat_forward_nhwc directly to avoid these two HBM transposes."""
    x_nhwc = jnp.transpose(x_nchw, (0, 2, 3, 1))
    out_nhwc = ubuilder_cat_forward_nhwc(x_nhwc, params, target_rows=target_rows)
    return jnp.transpose(out_nhwc, (0, 3, 1, 2))


# Pure-JAX reference (same math via XLA ops), used only for verification.
def ubuilder_cat_reference(x_nchw, params):
    def conv(x, w, b):
        y = lax.conv_general_dilated(
            x, w, (1, 1), "SAME",
            dimension_numbers=("NHWC", "HWIO", "NHWC"),
            precision=lax.Precision.HIGHEST)
        return jax.nn.relu(y + b.reshape(1, 1, 1, -1))

    wl, bl = params["left"]
    wt, bt = params["top"]
    wr, br = params["right"]
    x = jnp.transpose(x_nchw, (0, 2, 3, 1))
    x = conv(x, wl, bl)
    y = lax.reduce_window(x, jnp.array(-jnp.inf, x.dtype), lax.max,
                          (1, 2, 2, 1), (1, 2, 2, 1), "VALID")
    y = conv(y, wt, bt)
    y = jnp.repeat(jnp.repeat(y, 2, axis=1), 2, axis=2)
    y = jnp.concatenate([y, x], axis=-1)
    y = conv(y, wr, br)
    return jnp.transpose(y, (0, 3, 1, 2))


if __name__ == "__main__":
    key = jax.random.PRNGKey(0)
    N, Cin, H, W = 2, 4, 16, 16
    C, Cout = 8, 8
    ks = jax.random.split(key, 8)

    x_nchw = jax.random.normal(ks[0], (N, Cin, H, W), dtype=jnp.float32)

    def he_w(k, cin, cout):
        return (jax.random.normal(k, (3, 3, cin, cout), dtype=jnp.float32)
                * jnp.sqrt(2.0 / (9.0 * cin)))

    params = {
        "left":  (he_w(ks[1], Cin, C),
                  0.1 * jax.random.normal(ks[2], (1, C), dtype=jnp.float32)),
        "top":   (he_w(ks[3], C, C),
                  0.1 * jax.random.normal(ks[4], (1, C), dtype=jnp.float32)),
        "right": (he_w(ks[5], 2 * C, Cout),
                  0.1 * jax.random.normal(ks[6], (1, Cout), dtype=jnp.float32)),
    }

    out = jax.jit(ubuilder_cat_forward)(x_nchw, params)
    out = jax.block_until_ready(out)

    ref = ubuilder_cat_reference(x_nchw, params)
    err = float(jnp.max(jnp.abs(out - ref)))
    assert out.shape == (N, Cout, H, W), out.shape
    # bf16 MXU operands (f32 accumulation) vs f32 reference -> loose tolerance.
    assert err < 1e-1, f"max abs error vs reference: {err}"
    print("KERNEL_OK")
</pallas_src>

<mosaic_0001>
module attributes {stable_mosaic.version = 11 : i64} {
  func.func @kernel(%arg0: i32, %arg1: memref<32x64xf32, #tpu.memory_space<vmem>>, %arg2: memref<3x64x128xbf16, #tpu.memory_space<vmem>>, %arg3: memref<1x128xf32, #tpu.memory_space<vmem>>, %arg4: memref<3x64x64xbf16, #tpu.memory_space<vmem>>, %arg5: memref<1x64xf32, #tpu.memory_space<vmem>>, %arg6: memref<3x256x128xbf16, #tpu.memory_space<vmem>>, %arg7: memref<1x128xf32, #tpu.memory_space<vmem>>, %arg8: memref<128x128xbf16, #tpu.memory_space<vmem>>, %arg9: memref<16x32xbf16, #tpu.memory_space<vmem>>, %arg10: memref<32x16xbf16, #tpu.memory_space<vmem>>, %arg11: memref<64x128xbf16, #tpu.memory_space<vmem>>, %arg12: memref<32x128xf32, #tpu.memory_space<vmem>>, %arg13: memref<32x128xf32, #tpu.memory_space<vmem>>) attributes {dimension_semantics = [#tpu.dimension_semantics<parallel>], iteration_bounds = array<i64: 1>, scalar_prefetch = 0 : i64, scratch_operands = 1 : i64, tpu.core_type = #tpu.core_type<tc>, window_params = [{transform_indices = @transform_0, window_bounds = array<i64: 32, 64>}, {pipeline_mode = #tpu.pipeline_mode<synchronous>, transform_indices = @transform_1, window_bounds = array<i64: 3, 64, 128>}, {pipeline_mode = #tpu.pipeline_mode<synchronous>, transform_indices = @transform_2, window_bounds = array<i64: 1, 128>}, {pipeline_mode = #tpu.pipeline_mode<synchronous>, transform_indices = @transform_3, window_bounds = array<i64: 3, 64, 64>}, {pipeline_mode = #tpu.pipeline_mode<synchronous>, transform_indices = @transform_4, window_bounds = array<i64: 1, 64>}, {pipeline_mode = #tpu.pipeline_mode<synchronous>, transform_indices = @transform_5, window_bounds = array<i64: 3, 256, 128>}, {pipeline_mode = #tpu.pipeline_mode<synchronous>, transform_indices = @transform_6, window_bounds = array<i64: 1, 128>}, {pipeline_mode = #tpu.pipeline_mode<synchronous>, transform_indices = @transform_7, window_bounds = array<i64: 128, 128>}, {pipeline_mode = #tpu.pipeline_mode<synchronous>, transform_indices = @transform_8, window_bounds = array<i64: 16, 32>}, {pipeline_mode = #tpu.pipeline_mode<synchronous>, transform_indices = @transform_9, window_bounds = array<i64: 32, 16>}, {pipeline_mode = #tpu.pipeline_mode<synchronous>, transform_indices = @transform_10, window_bounds = array<i64: 64, 128>}, {transform_indices = @transform_11, window_bounds = array<i64: 32, 128>}]} {
    %0 = tpu.iota {dimensions = array<i32: 0>} : vector<32x1xi32>
    %c16_i32 = arith.constant 16 : i32
    %c0_i32 = arith.constant 0 : i32
    %1 = arith.cmpi eq, %c16_i32, %c0_i32 : i32
    %c1_i32 = arith.constant 1 : i32
    %2 = arith.select %1, %c1_i32, %c16_i32 : i32
    %3 = vector.broadcast %2 : i32 to vector<32x1xi32>
    %4 = arith.remsi %0, %3 : vector<32x1xi32>
    %c0_i32_0 = arith.constant 0 : i32
    %5 = vector.broadcast %c0_i32_0 : i32 to vector<32x1xi32>
    %6 = arith.cmpi ne, %4, %5 : vector<32x1xi32>
    %c0_i32_1 = arith.constant 0 : i32
    %7 = vector.broadcast %c0_i32_1 : i32 to vector<32x1xi32>
    %8 = arith.cmpi slt, %4, %7 : vector<32x1xi32>
    %c0_i32_2 = arith.constant 0 : i32
    %9 = arith.cmpi slt, %2, %c0_i32_2 : i32
    %10 = vector.broadcast %9 : i1 to vector<32x1xi1>
    %11 = vector.broadcast %10 : vector<32x1xi1> to vector<32x1xi1>
    %12 = arith.xori %8, %11 : vector<32x1xi1>
    %13 = arith.andi %12, %6 : vector<32x1xi1>
    %14 = vector.broadcast %2 : i32 to vector<32x1xi32>
    %15 = arith.addi %4, %14 : vector<32x1xi32>
    %16 = arith.select %13, %15, %4 : vector<32x1xi1>, vector<32x1xi32>
    %c0_i32_3 = arith.constant 0 : i32
    %17 = vector.broadcast %c0_i32_3 : i32 to vector<32x1xi32>
    %18 = arith.cmpi ne, %16, %17 : vector<32x1xi32>
    %c16_i32_4 = arith.constant 16 : i32
    %c0_i32_5 = arith.constant 0 : i32
    %19 = arith.cmpi eq, %c16_i32_4, %c0_i32_5 : i32
    %c1_i32_6 = arith.constant 1 : i32
    %20 = arith.select %19, %c1_i32_6, %c16_i32_4 : i32
    %21 = vector.broadcast %20 : i32 to vector<32x1xi32>
    %22 = arith.remsi %0, %21 : vector<32x1xi32>
    %c0_i32_7 = arith.constant 0 : i32
    %23 = vector.broadcast %c0_i32_7 : i32 to vector<32x1xi32>
    %24 = arith.cmpi ne, %22, %23 : vector<32x1xi32>
    %c0_i32_8 = arith.constant 0 : i32
    %25 = vector.broadcast %c0_i32_8 : i32 to vector<32x1xi32>
    %26 = arith.cmpi slt, %22, %25 : vector<32x1xi32>
    %c0_i32_9 = arith.constant 0 : i32
    %27 = arith.cmpi slt, %20, %c0_i32_9 : i32
    %28 = vector.broadcast %27 : i1 to vector<32x1xi1>
    %29 = vector.broadcast %28 : vector<32x1xi1> to vector<32x1xi1>
    %30 = arith.xori %26, %29 : vector<32x1xi1>
    %31 = arith.andi %30, %24 : vector<32x1xi1>
    %32 = vector.broadcast %20 : i32 to vector<32x1xi32>
    %33 = arith.addi %22, %32 : vector<32x1xi32>
    %34 = arith.select %31, %33, %22 : vector<32x1xi1>, vector<32x1xi32>
    %c15_i32 = arith.constant 15 : i32
    %35 = vector.broadcast %c15_i32 : i32 to vector<32x1xi32>
    %36 = arith.cmpi ne, %34, %35 : vector<32x1xi32>
    %37 = tpu.iota {dimensions = array<i32: 0>} : vector<16x1xi32>
    %c8_i32 = arith.constant 8 : i32
    %c0_i32_10 = arith.constant 0 : i32
    %38 = arith.cmpi eq, %c8_i32, %c0_i32_10 : i32
    %c1_i32_11 = arith.constant 1 : i32
    %39 = arith.select %38, %c1_i32_11, %c8_i32 : i32
    %40 = vector.broadcast %39 : i32 to vector<16x1xi32>
    %41 = arith.remsi %37, %40 : vector<16x1xi32>
    %c0_i32_12 = arith.constant 0 : i32
    %42 = vector.broadcast %c0_i32_12 : i32 to vector<16x1xi32>
    %43 = arith.cmpi ne, %41, %42 : vector<16x1xi32>
    %c0_i32_13 = arith.constant 0 : i32
    %44 = vector.broadcast %c0_i32_13 : i32 to vector<16x1xi32>
    %45 = arith.cmpi slt, %41, %44 : vector<16x1xi32>
    %c0_i32_14 = arith.constant 0 : i32
    %46 = arith.cmpi slt, %39, %c0_i32_14 : i32
    %47 = vector.broadcast %46 : i1 to vector<16x1xi1>
    %48 = vector.broadcast %47 : vector<16x1xi1> to vector<16x1xi1>
    %49 = arith.xori %45, %48 : vector<16x1xi1>
    %50 = arith.andi %49, %43 : vector<16x1xi1>
    %51 = vector.broadcast %39 : i32 to vector<16x1xi32>
    %52 = arith.addi %41, %51 : vector<16x1xi32>
    %53 = arith.select %50, %52, %41 : vector<16x1xi1>, vector<16x1xi32>
    %c0_i32_15 = arith.constant 0 : i32
    %54 = vector.broadcast %c0_i32_15 : i32 to vector<16x1xi32>
    %55 = arith.cmpi ne, %53, %54 : vector<16x1xi32>
    %c8_i32_16 = arith.constant 8 : i32
    %c0_i32_17 = arith.constant 0 : i32
    %56 = arith.cmpi eq, %c8_i32_16, %c0_i32_17 : i32
    %c1_i32_18 = arith.constant 1 : i32
    %57 = arith.select %56, %c1_i32_18, %c8_i32_16 : i32
    %58 = vector.broadcast %57 : i32 to vector<16x1xi32>
    %59 = arith.remsi %37, %58 : vector<16x1xi32>
    %c0_i32_19 = arith.constant 0 : i32
    %60 = vector.broadcast %c0_i32_19 : i32 to vector<16x1xi32>
    %61 = arith.cmpi ne, %59, %60 : vector<16x1xi32>
    %c0_i32_20 = arith.constant 0 : i32
    %62 = vector.broadcast %c0_i32_20 : i32 to vector<16x1xi32>
    %63 = arith.cmpi slt, %59, %62 : vector<16x1xi32>
    %c0_i32_21 = arith.constant 0 : i32
    %64 = arith.cmpi slt, %57, %c0_i32_21 : i32
    %65 = vector.broadcast %64 : i1 to vector<16x1xi1>
    %66 = vector.broadcast %65 : vector<16x1xi1> to vector<16x1xi1>
    %67 = arith.xori %63, %66 : vector<16x1xi1>
    %68 = arith.andi %67, %61 : vector<16x1xi1>
    %69 = vector.broadcast %57 : i32 to vector<16x1xi32>
    %70 = arith.addi %59, %69 : vector<16x1xi32>
    %71 = arith.select %68, %70, %59 : vector<16x1xi1>, vector<16x1xi32>
    %c7_i32 = arith.constant 7 : i32
    %72 = vector.broadcast %c7_i32 : i32 to vector<16x1xi32>
    %73 = arith.cmpi ne, %71, %72 : vector<16x1xi32>
    %c0 = arith.constant 0 : index
    %c0_22 = arith.constant 0 : index
    %74 = vector.load %arg1[%c0, %c0_22] : memref<32x64xf32, #tpu.memory_space<vmem>>, vector<32x64xf32>
    %c1_i32_23 = arith.constant 1 : i32
    %75 = tpu.dynamic_rotate %74 by %c1_i32_23 dim 0 : vector<32x64xf32>, i32 -> vector<32x64xf32>
    %cst = arith.constant 0.000000e+00 : f32
    %76 = vector.broadcast %cst : f32 to vector<32x64xf32>
    %77 = vector.shape_cast %18 : vector<32x1xi1> to vector<32x1xi1>
    %78 = vector.broadcast %77 : vector<32x1xi1> to vector<32x64xi1>
    %79 = arith.select %78, %75, %76 : vector<32x64xi1>, vector<32x64xf32>
    %c31_i32 = arith.constant 31 : i32
    %80 = tpu.dynamic_rotate %74 by %c31_i32 dim 0 : vector<32x64xf32>, i32 -> vector<32x64xf32>
    %cst_24 = arith.constant 0.000000e+00 : f32
    %81 = vector.broadcast %cst_24 : f32 to vector<32x64xf32>
    %82 = vector.shape_cast %36 : vector<32x1xi1> to vector<32x1xi1>
    %83 = vector.broadcast %82 : vector<32x1xi1> to vector<32x64xi1>
    %84 = arith.select %83, %80, %81 : vector<32x64xi1>, vector<32x64xf32>
    %85 = arith.truncf %79 : vector<32x64xf32> to vector<32x64xbf16>
    %c0_25 = arith.constant 0 : index
    %c0_26 = arith.constant 0 : index
    %c0_27 = arith.constant 0 : index
    %86 = vector.load %arg2[%c0_25, %c0_26, %c0_27] : memref<3x64x128xbf16, #tpu.memory_space<vmem>>, vector<1x64x128xbf16>
    %87 = vector.shape_cast %86 : vector<1x64x128xbf16> to vector<64x128xbf16>
    %cst_28 = arith.constant dense<0.000000e+00> : vector<32x128xf32>
    %88 = tpu.matmul %85, %87, %cst_28 {dimension_numbers = #tpu.dot_dimension_numbers<[1], [0], [0], [1], [0, 0, 1, 1], [], []>} : vector<32x64xbf16>, vector<64x128xbf16>, vector<32x128xf32> -> vector<32x128xf32>
    %89 = arith.truncf %74 : vector<32x64xf32> to vector<32x64xbf16>
    %c1 = arith.constant 1 : index
    %c0_29 = arith.constant 0 : index
    %c0_30 = arith.constant 0 : index
    %90 = vector.load %arg2[%c1, %c0_29, %c0_30] : memref<3x64x128xbf16, #tpu.memory_space<vmem>>, vector<1x64x128xbf16>
    %91 = vector.shape_cast %90 : vector<1x64x128xbf16> to vector<64x128xbf16>
    %cst_31 = arith.constant dense<0.000000e+00> : vector<32x128xf32>
    %92 = tpu.matmul %89, %91, %cst_31 {dimension_numbers = #tpu.dot_dimension_numbers<[1], [0], [0], [1], [0, 0, 1, 1], [], []>} : vector<32x64xbf16>, vector<64x128xbf16>, vector<32x128xf32> -> vector<32x128xf32>
    %93 = arith.addf %88, %92 : vector<32x128xf32>
    %94 = arith.truncf %84 : vector<32x64xf32> to vector<32x64xbf16>
    %c2 = arith.constant 2 : index
    %c0_32 = arith.constant 0 : index
    %c0_33 = arith.constant 0 : index
    %95 = vector.load %arg2[%c2, %c0_32, %c0_33] : memref<3x64x128xbf16, #tpu.memory_space<vmem>>, vector<1x64x128xbf16>
    %96 = vector.shape_cast %95 : vector<1x64x128xbf16> to vector<64x128xbf16>
    %cst_34 = arith.constant dense<0.000000e+00> : vector<32x128xf32>
    %97 = tpu.matmul %94, %96, %cst_34 {dimension_numbers = #tpu.dot_dimension_numbers<[1], [0], [0], [1], [0, 0, 1, 1], [], []>} : vector<32x64xbf16>, vector<64x128xbf16>, vector<32x128xf32> -> vector<32x128xf32>
    %98 = arith.addf %93, %97 : vector<32x128xf32>
    %c0_35 = arith.constant 0 : index
    %c0_36 = arith.constant 0 : index
    %99 = vector.load %arg3[%c0_35, %c0_36] : memref<1x128xf32, #tpu.memory_space<vmem>>, vector<1x128xf32>
    %100 = vector.broadcast %99 : vector<1x128xf32> to vector<32x128xf32>
    %101 = arith.addf %98, %100 : vector<32x128xf32>
    %cst_37 = arith.constant 0.000000e+00 : f32
    %102 = vector.broadcast %cst_37 : f32 to vector<32x128xf32>
    %103 = arith.maximumf %101, %102 : vector<32x128xf32>
    %c0_38 = arith.constant 0 : index
    %c0_39 = arith.constant 0 : index
    %104 = vector.load %arg13[%c0_38, %c0_39] : memref<32x128xf32, #tpu.memory_space<vmem>>, vector<32x128xf32>
    tpu.vector_store %arg13[%c0_38, %c0_39], %103 {strides = array<i32>} : memref<32x128xf32, #tpu.memory_space<vmem>>, vector<32x128xf32>,
    %105 = arith.truncf %103 : vector<32x128xf32> to vector<32x128xbf16>
    %c0_40 = arith.constant 0 : index
    %c0_41 = arith.constant 0 : index
    %106 = vector.load %arg8[%c0_40, %c0_41] : memref<128x128xbf16, #tpu.memory_space<vmem>>, vector<128x128xbf16>
    %cst_42 = arith.constant dense<0.000000e+00> : vector<32x128xf32>
    %107 = tpu.matmul %105, %106, %cst_42 {dimension_numbers = #tpu.dot_dimension_numbers<[1], [0], [0], [1], [0, 0, 1, 1], [], []>} : vector<32x128xbf16>, vector<128x128xbf16>, vector<32x128xf32> -> vector<32x128xf32>
    %108 = vector.extract_strided_slice %107 {offsets = [0, 0], sizes = [32, 64], strides = [1, 1]} : vector<32x128xf32> to vector<32x64xf32>
    %109 = vector.extract_strided_slice %107 {offsets = [0, 64], sizes = [32, 64], strides = [1, 1]} : vector<32x128xf32> to vector<32x64xf32>
    %110 = arith.maximumf %108, %109 : vector<32x64xf32>
    %c31_i32_43 = arith.constant 31 : i32
    %111 = tpu.dynamic_rotate %110 by %c31_i32_43 dim 0 : vector<32x64xf32>, i32 -> vector<32x64xf32>
    %112 = arith.maximumf %110, %111 : vector<32x64xf32>
    %c0_44 = arith.constant 0 : index
    %c0_45 = arith.constant 0 : index
    %113 = vector.load %arg9[%c0_44, %c0_45] : memref<16x32xbf16, #tpu.memory_space<vmem>>, vector<16x32xbf16>
    %114 = arith.truncf %112 : vector<32x64xf32> to vector<32x64xbf16>
    %cst_46 = arith.constant dense<0.000000e+00> : vector<16x64xf32>
    %115 = tpu.matmul %113, %114, %cst_46 {dimension_numbers = #tpu.dot_dimension_numbers<[1], [0], [0], [1], [0, 0, 1, 1], [], []>} : vector<16x32xbf16>, vector<32x64xbf16>, vector<16x64xf32> -> vector<16x64xf32>
    %c1_i32_47 = arith.constant 1 : i32
    %116 = tpu.dynamic_rotate %115 by %c1_i32_47 dim 0 : vector<16x64xf32>, i32 -> vector<16x64xf32>
    %cst_48 = arith.constant 0.000000e+00 : f32
    %117 = vector.broadcast %cst_48 : f32 to vector<16x64xf32>
    %118 = vector.shape_cast %55 : vector<16x1xi1> to vector<16x1xi1>
    %119 = vector.broadcast %118 : vector<16x1xi1> to vector<16x64xi1>
    %120 = arith.select %119, %116, %117 : vector<16x64xi1>, vector<16x64xf32>
    %c15_i32_49 = arith.constant 15 : i32
    %121 = tpu.dynamic_rotate %115 by %c15_i32_49 dim 0 : vector<16x64xf32>, i32 -> vector<16x64xf32>
    %cst_50 = arith.constant 0.000000e+00 : f32
    %122 = vector.broadcast %cst_50 : f32 to vector<16x64xf32>
    %123 = vector.shape_cast %73 : vector<16x1xi1> to vector<16x1xi1>
    %124 = vector.broadcast %123 : vector<16x1xi1> to vector<16x64xi1>
    %125 = arith.select %124, %121, %122 : vector<16x64xi1>, vector<16x64xf32>
    %126 = arith.truncf %120 : vector<16x64xf32> to vector<16x64xbf16>
    %c0_51 = arith.constant 0 : index
    %c0_52 = arith.constant 0 : index
    %c0_53 = arith.constant 0 : index
    %127 = vector.load %arg4[%c0_51, %c0_52, %c0_53] : memref<3x64x64xbf16, #tpu.memory_space<vmem>>, vector<1x64x64xbf16>
    %128 = vector.shape_cast %127 : vector<1x64x64xbf16> to vector<64x64xbf16>
    %cst_54 = arith.constant dense<0.000000e+00> : vector<16x64xf32>
    %129 = tpu.matmul %126, %128, %cst_54 {dimension_numbers = #tpu.dot_dimension_numbers<[1], [0], [0], [1], [0, 0, 1, 1], [], []>} : vector<16x64xbf16>, vector<64x64xbf16>, vector<16x64xf32> -> vector<16x64xf32>
    %130 = arith.truncf %115 : vector<16x64xf32> to vector<16x64xbf16>
    %c1_55 = arith.constant 1 : index
    %c0_56 = arith.constant 0 : index
    %c0_57 = arith.constant 0 : index
    %131 = vector.load %arg4[%c1_55, %c0_56, %c0_57] : memref<3x64x64xbf16, #tpu.memory_space<vmem>>, vector<1x64x64xbf16>
    %132 = vector.shape_cast %131 : vector<1x64x64xbf16> to vector<64x64xbf16>
    %cst_58 = arith.constant dense<0.000000e+00> : vector<16x64xf32>
    %133 = tpu.matmul %130, %132, %cst_58 {dimension_numbers = #tpu.dot_dimension_numbers<[1], [0], [0], [1], [0, 0, 1, 1], [], []>} : vector<16x64xbf16>, vector<64x64xbf16>, vector<16x64xf32> -> vector<16x64xf32>
    %134 = arith.addf %129, %133 : vector<16x64xf32>
    %135 = arith.truncf %125 : vector<16x64xf32> to vector<16x64xbf16>
    %c2_59 = arith.constant 2 : index
    %c0_60 = arith.constant 0 : index
    %c0_61 = arith.constant 0 : index
    %136 = vector.load %arg4[%c2_59, %c0_60, %c0_61] : memref<3x64x64xbf16, #tpu.memory_space<vmem>>, vector<1x64x64xbf16>
    %137 = vector.shape_cast %136 : vector<1x64x64xbf16> to vector<64x64xbf16>
    %cst_62 = arith.constant dense<0.000000e+00> : vector<16x64xf32>
    %138 = tpu.matmul %135, %137, %cst_62 {dimension_numbers = #tpu.dot_dimension_numbers<[1], [0], [0], [1], [0, 0, 1, 1], [], []>} : vector<16x64xbf16>, vector<64x64xbf16>, vector<16x64xf32> -> vector<16x64xf32>
    %139 = arith.addf %134, %138 : vector<16x64xf32>
    %c0_63 = arith.constant 0 : index
    %c0_64 = arith.constant 0 : index
    %140 = vector.load %arg5[%c0_63, %c0_64] : memref<1x64xf32, #tpu.memory_space<vmem>>, vector<1x64xf32>
    %141 = vector.broadcast %140 : vector<1x64xf32> to vector<16x64xf32>
    %142 = arith.addf %139, %141 : vector<16x64xf32>
    %cst_65 = arith.constant 0.000000e+00 : f32
    %143 = vector.broadcast %cst_65 : f32 to vector<16x64xf32>
    %144 = arith.maximumf %142, %143 : vector<16x64xf32>
    %c0_66 = arith.constant 0 : index
    %c0_67 = arith.constant 0 : index
    %145 = vector.load %arg10[%c0_66, %c0_67] : memref<32x16xbf16, #tpu.memory_space<vmem>>, vector<32x16xbf16>
    %146 = arith.truncf %144 : vector<16x64xf32> to vector<16x64xbf16>
    %cst_68 = arith.constant dense<0.000000e+00> : vector<32x64xf32>
    %147 = tpu.matmul %145, %146, %cst_68 {dimension_numbers = #tpu.dot_dimension_numbers<[1], [0], [0], [1], [0, 0, 1, 1], [], []>} : vector<32x16xbf16>, vector<16x64xbf16>, vector<32x64xf32> -> vector<32x64xf32>
    %148 = arith.truncf %147 : vector<32x64xf32> to vector<32x64xbf16>
    %c0_69 = arith.constant 0 : index
    %c0_70 = arith.constant 0 : index
    %149 = vector.load %arg11[%c0_69, %c0_70] : memref<64x128xbf16, #tpu.memory_space<vmem>>, vector<64x128xbf16>
    %cst_71 = arith.constant dense<0.000000e+00> : vector<32x128xf32>
    %150 = tpu.matmul %148, %149, %cst_71 {dimension_numbers = #tpu.dot_dimension_numbers<[1], [0], [0], [1], [0, 0, 1, 1], [], []>} : vector<32x64xbf16>, vector<64x128xbf16>, vector<32x128xf32> -> vector<32x128xf32>
    %c0_72 = arith.constant 0 : index
    %c0_73 = arith.constant 0 : index
    %151 = vector.load %arg13[%c0_72, %c0_73] : memref<32x128xf32, #tpu.memory_space<vmem>>, vector<32x128xf32>
    %152 = tpu.concatenate %150, %151 in 1 : vector<32x128xf32>, vector<32x128xf32> -> vector<32x256xf32>
    %c1_i32_74 = arith.constant 1 : i32
    %153 = tpu.dynamic_rotate %152 by %c1_i32_74 dim 0 : vector<32x256xf32>, i32 -> vector<32x256xf32>
    %cst_75 = arith.constant 0.000000e+00 : f32
    %154 = vector.broadcast %cst_75 : f32 to vector<32x256xf32>
    %155 = vector.shape_cast %18 : vector<32x1xi1> to vector<32x1xi1>
    %156 = vector.broadcast %155 : vector<32x1xi1> to vector<32x256xi1>
    %157 = arith.select %156, %153, %154 : vector<32x256xi1>, vector<32x256xf32>
    %c31_i32_76 = arith.constant 31 : i32
    %158 = tpu.dynamic_rotate %152 by %c31_i32_76 dim 0 : vector<32x256xf32>, i32 -> vector<32x256xf32>
    %cst_77 = arith.constant 0.000000e+00 : f32
    %159 = vector.broadcast %cst_77 : f32 to vector<32x256xf32>
    %160 = vector.shape_cast %36 : vector<32x1xi1> to vector<32x1xi1>
    %161 = vector.broadcast %160 : vector<32x1xi1> to vector<32x256xi1>
    %162 = arith.select %161, %158, %159 : vector<32x256xi1>, vector<32x256xf32>
    %163 = arith.truncf %157 : vector<32x256xf32> to vector<32x256xbf16>
    %c0_78 = arith.constant 0 : index
    %c0_79 = arith.constant 0 : index
    %c0_80 = arith.constant 0 : index
    %164 = vector.load %arg6[%c0_78, %c0_79, %c0_80] : memref<3x256x128xbf16, #tpu.memory_space<vmem>>, vector<1x256x128xbf16>
    %165 = vector.shape_cast %164 : vector<1x256x128xbf16> to vector<256x128xbf16>
    %cst_81 = arith.constant dense<0.000000e+00> : vector<32x128xf32>
    %166 = tpu.matmul %163, %165, %cst_81 {dimension_numbers = #tpu.dot_dimension_numbers<[1], [0], [0], [1], [0, 0, 1, 1], [], []>} : vector<32x256xbf16>, vector<256x128xbf16>, vector<32x128xf32> -> vector<32x128xf32>
    %167 = arith.truncf %152 : vector<32x256xf32> to vector<32x256xbf16>
    %c1_82 = arith.constant 1 : index
    %c0_83 = arith.constant 0 : index
    %c0_84 = arith.constant 0 : index
    %168 = vector.load %arg6[%c1_82, %c0_83, %c0_84] : memref<3x256x128xbf16, #tpu.memory_space<vmem>>, vector<1x256x128xbf16>
    %169 = vector.shape_cast %168 : vector<1x256x128xbf16> to vector<256x128xbf16>
    %cst_85 = arith.constant dense<0.000000e+00> : vector<32x128xf32>
    %170 = tpu.matmul %167, %169, %cst_85 {dimension_numbers = #tpu.dot_dimension_numbers<[1], [0], [0], [1], [0, 0, 1, 1], [], []>} : vector<32x256xbf16>, vector<256x128xbf16>, vector<32x128xf32> -> vector<32x128xf32>
    %171 = arith.addf %166, %170 : vector<32x128xf32>
    %172 = arith.truncf %162 : vector<32x256xf32> to vector<32x256xbf16>
    %c2_86 = arith.constant 2 : index
    %c0_87 = arith.constant 0 : index
    %c0_88 = arith.constant 0 : index
    %173 = vector.load %arg6[%c2_86, %c0_87, %c0_88] : memref<3x256x128xbf16, #tpu.memory_space<vmem>>, vector<1x256x128xbf16>
    %174 = vector.shape_cast %173 : vector<1x256x128xbf16> to vector<256x128xbf16>
    %cst_89 = arith.constant dense<0.000000e+00> : vector<32x128xf32>
    %175 = tpu.matmul %172, %174, %cst_89 {dimension_numbers = #tpu.dot_dimension_numbers<[1], [0], [0], [1], [0, 0, 1, 1], [], []>} : vector<32x256xbf16>, vector<256x128xbf16>, vector<32x128xf32> -> vector<32x128xf32>
    %176 = arith.addf %171, %175 : vector<32x128xf32>
    %c0_90 = arith.constant 0 : index
    %c0_91 = arith.constant 0 : index
    %177 = vector.load %arg7[%c0_90, %c0_91] : memref<1x128xf32, #tpu.memory_space<vmem>>, vector<1x128xf32>
    %178 = vector.broadcast %177 : vector<1x128xf32> to vector<32x128xf32>
    %179 = arith.addf %176, %178 : vector<32x128xf32>
    %cst_92 = arith.constant 0.000000e+00 : f32
    %180 = vector.broadcast %cst_92 : f32 to vector<32x128xf32>
    %181 = arith.maximumf %179, %180 : vector<32x128xf32>
    %c0_93 = arith.constant 0 : index
    %c0_94 = arith.constant 0 : index
    %182 = vector.load %arg12[%c0_93, %c0_94] : memref<32x128xf32, #tpu.memory_space<vmem>>, vector<32x128xf32>
    tpu.vector_store %arg12[%c0_93, %c0_94], %181 {strides = array<i32>} : memref<32x128xf32, #tpu.memory_space<vmem>>, vector<32x128xf32>,
    return
  }
  func.func @transform_0(%arg0: i32) -> (i32, i32) {
    %c0_i32 = arith.constant 0 : i32
    %c0_i32_0 = arith.constant 0 : i32
    return %arg0, %c0_i32 : i32, i32
  }
  func.func @transform_1(%arg0: i32) -> (i32, i32, i32) {
    %c0_i32 = arith.constant 0 : i32
    %c0_i32_0 = arith.constant 0 : i32
    %c0_i32_1 = arith.constant 0 : i32
    %c0_i32_2 = arith.constant 0 : i32
    return %c0_i32, %c0_i32_0, %c0_i32_1 : i32, i32, i32
  }
  func.func @transform_2(%arg0: i32) -> (i32, i32) {
    %c0_i32 = arith.constant 0 : i32
    %c0_i32_0 = arith.constant 0 : i32
    %c0_i32_1 = arith.constant 0 : i32
    return %c0_i32, %c0_i32_0 : i32, i32
  }
  func.func @transform_3(%arg0: i32) -> (i32, i32, i32) {
    %c0_i32 = arith.constant 0 : i32
    %c0_i32_0 = arith.constant 0 : i32
    %c0_i32_1 = arith.constant 0 : i32
    %c0_i32_2 = arith.constant 0 : i32
    return %c0_i32, %c0_i32_0, %c0_i32_1 : i32, i32, i32
  }
  func.func @transform_4(%arg0: i32) -> (i32, i32) {
    %c0_i32 = arith.constant 0 : i32
    %c0_i32_0 = arith.constant 0 : i32
    %c0_i32_1 = arith.constant 0 : i32
    return %c0_i32, %c0_i32_0 : i32, i32
  }
  func.func @transform_5(%arg0: i32) -> (i32, i32, i32) {
    %c0_i32 = arith.constant 0 : i32
    %c0_i32_0 = arith.constant 0 : i32
    %c0_i32_1 = arith.constant 0 : i32
    %c0_i32_2 = arith.constant 0 : i32
    return %c0_i32, %c0_i32_0, %c0_i32_1 : i32, i32, i32
  }
  func.func @transform_6(%arg0: i32) -> (i32, i32) {
    %c0_i32 = arith.constant 0 : i32
    %c0_i32_0 = arith.constant 0 : i32
    %c0_i32_1 = arith.constant 0 : i32
    return %c0_i32, %c0_i32_0 : i32, i32
  }
  func.func @transform_7(%arg0: i32) -> (i32, i32) {
    %c0_i32 = arith.constant 0 : i32
    %c0_i32_0 = arith.constant 0 : i32
    %c0_i32_1 = arith.constant 0 : i32
    return %c0_i32, %c0_i32_0 : i32, i32
  }
  func.func @transform_8(%arg0: i32) -> (i32, i32) {
    %c0_i32 = arith.constant 0 : i32
    %c0_i32_0 = arith.constant 0 : i32
    %c0_i32_1 = arith.constant 0 : i32
    return %c0_i32, %c0_i32_0 : i32, i32
  }
  func.func @transform_9(%arg0: i32) -> (i32, i32) {
    %c0_i32 = arith.constant 0 : i32
    %c0_i32_0 = arith.constant 0 : i32
    %c0_i32_1 = arith.constant 0 : i32
    return %c0_i32, %c0_i32_0 : i32, i32
  }
  func.func @transform_10(%arg0: i32) -> (i32, i32) {
    %c0_i32 = arith.constant 0 : i32
    %c0_i32_0 = arith.constant 0 : i32
    %c0_i32_1 = arith.constant 0 : i32
    return %c0_i32, %c0_i32_0 : i32, i32
  }
  func.func @transform_11(%arg0: i32) -> (i32, i32) {
    %c0_i32 = arith.constant 0 : i32
    %c0_i32_0 = arith.constant 0 : i32
    return %arg0, %c0_i32 : i32, i32
  }
}

</mosaic_0001>

<bundles_post_ra>
// kernel: ubuilder_cat_forward.1
= control target key start
LH: loop header
LB: loop body
LE: loop exit
PB: predicated region body
PF: predicated region fallthrough
CT: control target
= control target key end

     0   :  { %v39_v0 = vlaneseq  ;;  %vm219_vm0 = vcmask 523264   ;;  %vm2305_vm7 = vmmov 0   ;;  %vm623_vm8 = vcmask 261120   ;;  %s2921_s1 = inlined_call_operand.vmem [shape: bf16[3,64,128], index: 1, kind: input, shape index: {}]   ;;  %s2922_s0 = inlined_call_operand.vmem [shape: f32[32,64], index: 0, kind: input, shape index: {}]   ;;  %s2923_s7 = inlined_call_operand.vmem [shape: bf16[128,128], index: 7, kind: input, shape index: {}]   ;;  %s2924_s2 = inlined_call_operand.vmem [shape: f32[1,128], index: 2, kind: input, shape index: {}]   ;;  %s2925_s8 = inlined_call_operand.vmem [shape: bf16[16,32], index: 8, kind: input, shape index: {}]   ;;  %s2926_s3 = inlined_call_operand.vmem [shape: bf16[3,64,64], index: 3, kind: input, shape index: {}]   ;;  %s2927_s9 = inlined_call_operand.vmem [shape: bf16[32,16], index: 9, kind: input, shape index: {}]   ;;  %s2928_s10 = inlined_call_operand.vmem [shape: bf16[64,128], index: 10, kind: input, shape index: {}]   ;;  %s2929_s4 = inlined_call_operand.vmem [shape: f32[1,64], index: 4, kind: input, shape index: {}]   ;;  %s2930_s5 = inlined_call_operand.vmem [shape: bf16[3,256,128], index: 5, kind: input, shape index: {}]   ;;  %s2931_s6 = inlined_call_operand.vmem [shape: f32[1,128], index: 6, kind: input, shape index: {}]   ;;  %s2932_s11 = inlined_call_operand.vmem [shape: f32[32,128], index: 11, kind: output, shape index: {}]  }
   0x1   :  { %v2216_v1 = vld [vmem:[%s2921_s1 + $0x20] sm:$0xff]   ;;  %v2217_v2 = vld [vmem:[%s2921_s1 + $0x28] sm:$0xff]   ;;  %v2218_v4 = vld [vmem:[%s2921_s1 + $0x30] sm:$0xff]   ;;  %vm949_vm13 = vcmask 130048   ;;  %vm2306_vm14 = vmmov 1  }
   0x2   :  { %v2373_v3 = vshrl.u32 %v39_v0, 7  ;;  %2081 = vmatprep.subr.bf16.mxu0 %v2216_v1  ;;  %v2381_v5 = vld [vmem:[%s2922_s0] sm:$0xff]  ;;  %v2386_v6 = vld [vmem:[%s2922_s0 + $0x8] sm:$0xff]  ;;  %v2395_v10 = vld [vmem:[%s2922_s0 + $0x18] sm:$0xff] }
   0x3   :  { %2082 = vmatpush3.bf16.msra.mxu0 %v2216_v1  ;;  %v132_v7 = vrot.slane %v2381_v5, 7  ;;  %v184_v9 = vpack.c.bf16 %v2386_v6, %v2381_v5  ;;  %v135_v11 = vrot.slane %v2395_v10, 7  ;;  %v2219_v12 = vld [vmem:[%s2921_s1 + $0x38] sm:$0xff]   ;;  %v133_v13 = vrot.slane %v2386_v6, 7  ;;  %v2413_v16 = vld [vmem:[%s2922_s0 + $0x10] sm:$0xff]  ;;  %v2220_v17 = vld [vmem:[%s2921_s1] sm:$0xff]  }
   0x4   :  { %2083 = vmatprep.subr.bf16.mxu0 %v2217_v2  ;;  %v48_v8 = vand.u32 15, %v2373_v3  ;;  %vm136_vm1 = vcmp.lt.s32.totalorder %v2373_v3, 1  ;;  %v185_v20 = vpack.c.bf16 %v2395_v10, %v2413_v16  ;;  %v2221_v21 = vld [vmem:[%s2921_s1 + $0x8] sm:$0xff]   ;;  %v42_v22 = vadd.s32 16, %v2373_v3  ;;  %v2228_v23 = vld [vmem:[%s2923_s7] sm:$0xff]   ;;  %v2230_v29 = vld [vmem:[%s2923_s7 + $0x10] sm:$0xff]  }
   0x5   :  { %2089 = vmatprep.mubr.msk.bf16.mxu0 %vm219_vm0, %v184_v9  ;;  %v140_v15 = vsel %vm136_vm1, %v135_v11, %v132_v7  ;;  %v139_v18 = vsel %vm136_vm1, %v132_v7, %v133_v13  ;;  %v2432_v25 = vadd.s32 8, %v2373_v3  ;;  %2117 = vmatprep.subr.bf16.mxu1 %v2228_v23  ;;  %v2229_v26 = vld [vmem:[%s2923_s7 + $0x8] sm:$0xff]   ;;  %v154_v27 = vrot.slane %v2386_v6, 1  ;;  %v2222_v32 = vld [vmem:[%s2921_s1 + $0x10] sm:$0xff]   ;;  %v2231_v34 = vld [vmem:[%s2923_s7 + $0x18] sm:$0xff]  }
   0x6   :  { %vm2404_vm2 = vcmp.ne.s32.totalorder %v48_v8, 0  ;;  %2118 = vmatpush3.bf16.msra.mxu1 %v2228_v23  ;;  %v134_v28 = vrot.slane %v2413_v16, 7  ;;  %v155_v30 = vrot.slane %v2413_v16, 1  ;;  %v62_v31 = vand.u32 15, %v42_v22  ;;  %v2223_v36 = vld [vmem:[%s2921_s1 + $0x18] sm:$0xff]   ;;  %v2232_v41 = vld [vmem:[%s2923_s7 + $0x20] sm:$0xff]  }
   0x7   :  { %2084 = vmatpush3.bf16.msra.mxu0 %v2217_v2  ;;  %v149_v19 = vsel %vm2404_vm2, %v140_v15, 0.0  ;;  %2119 = vmatprep.subr.bf16.mxu1 %v2229_v26  ;;  %v55_v33 = vand.u32 15, %v2432_v25  ;;  %vm157_vm3 = vcmp.lt.s32.totalorder %v2373_v3, 7  ;;  %v153_v35 = vrot.slane %v2381_v5, 1  ;;  %v2224_v44 = vld [vmem:[%s2921_s1 + $0x40] sm:$0xff]   ;;  %v2233_v48 = vld [vmem:[%s2923_s7 + $0x28] sm:$0xff]   ;;  %vm2746_vm15 = vmpackc.low %vm2306_vm14, %vm2404_vm2 }
   0x8   :  { %2085 = vmatprep.subr.bf16.mxu0 %v2218_v4  ;;  %v174_v24 = vpack.c.bf16 %v139_v18, %v149_v19  ;;  %vm2457_vm4 = vcmp.ne.s32.totalorder %v62_v31, 0  ;;  %v138_v38 = vsel %vm136_vm1, %v133_v13, %v134_v28  ;;  %v159_v40 = vsel %vm157_vm3, %v154_v27, %v155_v30  ;;  %v2225_v50 = vld [vmem:[%s2921_s1 + $0x48] sm:$0xff]   ;;  %v2226_v53 = vld [vmem:[%s2921_s1 + $0x50] sm:$0xff]   ;;  %v2227_v55 = vld [vmem:[%s2921_s1 + $0x58] sm:$0xff]  }
   0x9   :  { %vm2463_vm5 = vcmp.ne.s32.totalorder %v55_v33, 15  ;;  %v137_v42 = vsel %vm136_vm1, %v134_v28, %v135_v11  ;;  %v151_v43 = vsel %vm2457_vm4, %v138_v38, 0.0  ;;  %v160_v45 = vsel %vm157_vm3, %v153_v35, %v154_v27  ;;  %v2234_v61 = vld [vmem:[%s2923_s7 + $0x30] sm:$0xff]   ;;  %v2235_v62 = vld [vmem:[%s2923_s7 + $0x38] sm:$0xff]   ;;  %v1752_v63 = vld [vmem:[%s2924_s2] ss:$0 sm:$0xff] }
   0xa   :  { %2120 = vmatpush3.bf16.msra.mxu1 %v2229_v26  ;;  %v171_v46 = vsel %vm2463_vm5, %v159_v40, 0.0  ;;  %v175_v47 = vpack.c.bf16 %v137_v42, %v151_v43  ;;  %v43_v51 = vadd.s32 24, %v2373_v3  ;;  %v156_v52 = vrot.slane %v2395_v10, 1  ;;  %s2303_s2 = smov 64   ;;  %v2264_v14 = vld [vmem:[%s2930_s5 + $0x8] sm:$0xff]   ;;  %v2292_v37 = vld [vmem:[%s2930_s5 + $0x110] sm:$0xff]  }
   0xb   :  { %2086 = vmatpush3.bf16.msra.mxu0 %v2218_v4  ;;  %2121 = vmatprep.subr.bf16.mxu1 %v2230_v29  ;;  %v354_v49 = vpack.c.bf16 %v171_v46, %v160_v45  ;;  %v2237_v45 = vld [vmem:[%s2926_s3 + $0x20] sm:$0xff]   ;;  %v2238_v46 = vld [vmem:[%s2926_s3 + $0x28] sm:$0xff]   ;;  %v2294_v39 = vld [vmem:[%s2930_s5 + $0x118] sm:$0xff]  }
   0xc   :  { %2087 = vmatprep.subr.bf16.mxu0 %v2219_v12  ;;  %v69_v54 = vand.u32 15, %v43_v51  ;;  %v161_v57 = vsel %vm157_vm3, %v156_v52, %v153_v35  ;;  %v158_v58 = vsel %vm157_vm3, %v155_v30, %v156_v52 }
   0xe   :  { %2122 = vmatpush3.bf16.msra.mxu1 %v2230_v29  ;;  %vm2499_vm6 = vcmp.ne.s32.totalorder %v69_v54, 15 }
   0xf   :  { %2088 = vmatpush3.bf16.msra.mxu0 %v2219_v12  ;;  %2123 = vmatprep.subr.bf16.mxu1 %v2231_v34  ;;  %v173_v59 = vsel %vm2499_vm6, %v161_v57, 0.0  ;;  %vm1935_vm2 = vmpackc.low %vm2499_vm6, %vm2306_vm14 }
  0x10   :  { %2093 = vmatprep.subr.bf16.mxu0 %v2220_v17  ;;  %v355_v60 = vpack.c.bf16 %v173_v59, %v158_v58 }
  0x12   :  { %2090 = vmatmul.mubr.msk.bf16.vlgmr.msra.gmra.mrb[0].mxu0 %vm219_vm0, %v185_v20  ;;  %2124 = vmatpush3.bf16.msra.mxu1 %v2231_v34 }
  0x13   :  { %2094 = vmatpush3.bf16.msra.mxu0 %v2220_v17  ;;  %2101 = vmatprep.mubr.msk.bf16.mxu0 %vm219_vm0, %v174_v24 }
  0x14   :  { %2095 = vmatprep.subr.bf16.mxu0 %v2221_v21  ;;  %2125 = vmatprep.subr.bf16.mxu1 %v2232_v41 }
  0x16   :  { %2126 = vmatpush3.bf16.msra.mxu1 %v2232_v41 }
  0x17   :  { %2096 = vmatpush3.bf16.msra.mxu0 %v2221_v21  ;;  %2127 = vmatprep.subr.bf16.mxu1 %v2233_v48 }
  0x18   :  { %2097 = vmatprep.subr.bf16.mxu0 %v2222_v32 }
  0x1a   :  { %2128 = vmatpush3.bf16.msra.mxu1 %v2233_v48 }
  0x1b   :  { %2098 = vmatpush3.bf16.msra.mxu0 %v2222_v32  ;;  %2129 = vmatprep.subr.bf16.mxu1 %v2234_v61 }
  0x1c   :  { %2099 = vmatprep.subr.bf16.mxu0 %v2223_v36 }
  0x1e   :  { %2130 = vmatpush3.bf16.msra.mxu1 %v2234_v61 }
  0x1f   :  { %2100 = vmatpush3.bf16.msra.mxu0 %v2223_v36  ;;  %2131 = vmatprep.subr.bf16.mxu1 %v2235_v62 }
  0x20   :  { %2105 = vmatprep.subr.bf16.mxu0 %v2224_v44 }
  0x22   :  { %2102 = vmatmul.mubr.msk.bf16.vlgmr.msra.gmra.mrb[0].mxu0 %vm219_vm0, %v175_v47  ;;  %2132 = vmatpush3.bf16.msra.mxu1 %v2235_v62  ;;  %v2240_v47 = vld [vmem:[%s2926_s3 + $0x30] sm:$0xff]  }
  0x23   :  { %2106 = vmatpush3.bf16.msra.mxu0 %v2224_v44  ;;  %2113 = vmatprep.mubr.msk.bf16.mxu0 %vm219_vm0, %v354_v49  ;;  %v2304_v44 = vmov 0.0  }
  0x24   :  { %2107 = vmatprep.subr.bf16.mxu0 %v2225_v50  ;;  %2145 = vmatprep.subr.bf16.mxu1 %v2304_v44 }
  0x27   :  { %2108 = vmatpush3.bf16.msra.mxu0 %v2225_v50 }
  0x28   :  { %2109 = vmatprep.subr.bf16.mxu0 %v2226_v53 }
  0x2b   :  { %2110 = vmatpush3.bf16.msra.mxu0 %v2226_v53 }
  0x2c   :  { %2111 = vmatprep.subr.bf16.mxu0 %v2227_v55 }
  0x2f   :  { %2112 = vmatpush3.bf16.msra.mxu0 %v2227_v55 }
  0x30   :  { %2137 = vmatprep.subr.bf16.mxu0 %v2304_v44 }
  0x32   :  { %2114 = vmatmul.mubr.msk.bf16.vlgmr.msra.gmra.mrb[0].mxu0 %vm219_vm0, %v355_v60 }
  0x33   :  { %2141 = vmatprep.mubr.msk.bf16.mxu0 %vm2305_vm7, %v2304_v44 }
 0x105   :  { %v2115_v0 = vpop.f32.mrb[0].mxu0 }
 0x106   :  { %v457_v1 = vadd.f32 %v2115_v0, %v1752_v63  ;;  %v429_v2 = vpop.f32.mrb[1].mxu0 }
 0x107   :  { %v455_v4 = vadd.f32 %v1752_v63, %v429_v2  ;;  %v2116_v5 = vpop.f32.mrb[2].mxu0 }
 0x108   :  { %v461_v6 = vmax.f32 %v457_v1, 0.0  ;;  %v458_v7 = vadd.f32 %v2116_v5, %v1752_v63  ;;  %v432_v8 = vpop.f32.mrb[3].mxu0 }
 0x109   :  { %v459_v9 = vmax.f32 %v455_v4, 0.0  ;;  %v456_v10 = vadd.f32 %v1752_v63, %v432_v8 }
 0x10a   :  { %v462_v11 = vmax.f32 %v458_v7, 0.0  ;;  %v1103_v12 = vrot.slane %v461_v6, 7  ;;  %v1127_v17 = vrot.slane %v461_v6, 1 }
 0x10b   :  { %v1099_v13 = vrot.slane %v459_v9, 7  ;;  %v1123_v15 = vrot.slane %v459_v9, 1  ;;  %v460_v16 = vmax.f32 %v456_v10, 0.0  ;;  %v2239_v10 = vld [vmem:[%s2926_s3] sm:$0xff]  }
 0x10c   :  { %v1105_v18 = vrot.slane %v462_v11, 7  ;;  %v1129_v19 = vrot.slane %v462_v11, 1  ;;  %v2519_v20 = vpack.c.bf16 %v462_v11, %v461_v6  ;;  %v2241_v11 = vld [vmem:[%s2926_s3 + $0x8] sm:$0xff]  }
 0x10d   :  { %v1101_v21 = vrot.slane %v460_v16, 7  ;;  %v1125_v22 = vrot.slane %v460_v16, 1  ;;  %v2521_v23 = vpack.c.bf16 %v460_v16, %v459_v9  ;;  %v2236_v9 = vld [vmem:[%s2925_s8] sm:$0xff]   ;;  %v104_v16 = vand.u32 7, %v2373_v3  ;;  %v2291_v3 = vld [vmem:[%s2930_s5 + $0x150] sm:$0xff]  }
 0x10e   :  { %v2525_v24 = vsel %vm136_vm1, %v1105_v18, %v1099_v13  ;;  %v2529_v26 = vsel %vm136_vm1, %v1103_v12, %v1105_v18  ;;  %v2533_v27 = vsel %vm157_vm3, %v1127_v17, %v1129_v19  ;;  %v2537_v28 = vsel %vm157_vm3, %v1129_v19, %v1123_v15 }
 0x10f   :  { %2133 = vmatprep.mubr.bf16.mxu1 %v2521_v23  ;;  %v2542_v29 = vsel %vm136_vm1, %v1099_v13, %v1101_v21  ;;  %v2546_v30 = vsel %vm136_vm1, %v1101_v21, %v1103_v12  ;;  %v2550_v31 = vsel %vm157_vm3, %v1125_v22, %v1127_v17  ;;  %v2554_v32 = vsel %vm157_vm3, %v1123_v15, %v1125_v22  ;;  %v2242_v12 = vld [vmem:[%s2926_s3 + $0x38] sm:$0xff]   ;;  %v2243_v13 = vld [vmem:[%s2926_s3 + $0x10] sm:$0xff]  }
 0x110   :  { %2134 = vmatmul.mubr.bf16.vlgmr.msra.gmra.mrb[0].mxu1 %v2519_v20  ;;  %v1870_v33 = vpack.c.bf16 %v2542_v29, %v2525_v24  ;;  %v1876_v34 = vpack.c.bf16 %v2529_v26, %v2546_v30  ;;  %v1930_v35 = vpack.c.bf16 %v2550_v31, %v2554_v32  ;;  %v1936_v36 = vpack.c.bf16 %v2537_v28, %v2533_v27  ;;  %v2245_v15 = vld [vmem:[%s2926_s3 + $0x18] sm:$0xff]   ;;  %v2295_v30 = vld [vmem:[%s2930_s5 + $0x160] sm:$0xff]   ;;  %v2297_v32 = vld [vmem:[%s2930_s5 + $0x168] sm:$0xff]  }
 0x111   :  { %2153 = vmatprep.mubr.msk.bf16.mxu1 %vm2305_vm7, %v2304_v44  ;;  %2146 = vmatpush3.bf16.msra.mxu1 %v2237_v45  ;;  %v111_v17 = vand.u32 7, %v2432_v25  ;;  %vm2619_vm9 = vcmp.ne.s32.totalorder %v104_v16, 0  ;;  %vm2627_vm11 = vcmp.ne.s32.totalorder %v104_v16, 7  ;;  %v2270_v24 = vld [vmem:[%s2930_s5 + $0x58] sm:$0xff]   ;;  %v2296_v31 = vld [vmem:[%s2930_s5 + $0x120] sm:$0xff]  }
 0x112   :  { %2147 = vmatprep.subr.bf16.mxu1 %v2304_v44  ;;  %v2272_v29 = vld [vmem:[%s2930_s5 + $0x18] sm:$0xff]  }
 0x113   :  { %vm2623_vm10 = vcmp.ne.s32.totalorder %v111_v17, 0  ;;  %vm2631_vm12 = vcmp.ne.s32.totalorder %v111_v17, 7  ;;  %v2293_v26 = vld [vmem:[%s2930_s5 + $0x158] sm:$0xff]  }
 0x115   :  { %2148 = vmatpush3.bf16.msra.mxu1 %v2238_v46 }
 0x116   :  { %2149 = vmatprep.subr.bf16.mxu1 %v2304_v44 }
 0x119   :  { %2150 = vmatpush3.bf16.msra.mxu1 %v2240_v47 }
 0x11a   :  { %2151 = vmatprep.subr.bf16.mxu1 %v2304_v44 }
 0x11d   :  { %2152 = vmatpush3.bf16.msra.mxu1 %v2242_v12 }
 0x11e   :  { %2169 = vmatprep.subr.bf16.mxu1 %v2304_v44 }
 0x1e3   :  { %v2135_v38 = vpop.f32.mrb[0].mxu1 }
 0x1e4   :  { %v567_v40 = vpop.f32.mrb[1].mxu1 }
 0x1e5   :  { %v2136_v41 = vpop.f32.mrb[2].mxu1 }
 0x1e6   :  { %592 = vrot.lane.b32.xlu1 %v2136_v41, %s2303_s2  ;;  %v570_v42 = vpop.f32.mrb[3].mxu1 }
 0x1e7   :  { %v2211_v43 = vpack.i.bf16 %v570_v42, %v567_v40 }
 0x1e9   :  { %2212 = vrot.lane.b32.xlu0 %v2211_v43, %s2303_s2 }
 0x1ed   :  { %590 = vrot.lane.b32.xlu0 %v2135_v38, %s2303_s2 }
 0x258   :  { %v593_v48 = vpop.permute.xlu1 %592 }
 0x259   :  { %v601_v50 = vmax.f32 %v2136_v41, %v593_v48  ;;  %v2252_v41 = vld [vmem:[%s2928_s10 + $0x8] sm:$0xff]  }
 0x25b   :  { %v2213_v49 = vpop.permute.xlu0 %2212  ;;  %v605_v57 = vrot.slane %v601_v50, 1 }
 0x25c   :  { %v2215_v51 = vunpack.i.h.bf16 %v2213_v49  ;;  %v2214_v52 = vunpack.i.l.bf16 %v2213_v49 }
 0x25e   :  { %v599_v53 = vmax.f32 %v570_v42, %v2215_v51  ;;  %v598_v54 = vmax.f32 %v567_v40, %v2214_v52  ;;  %v2244_v42 = vld [vmem:[%s2926_s3 + $0x40] sm:$0xff]   ;;  %v2250_v40 = vld [vmem:[%s2927_s9 + $0x8] sm:$0xff]  }
 0x25f   :  { %v591_v55 = vpop.permute.xlu0 %590 }
 0x260   :  { %v603_v58 = vrot.slane %v599_v53, 1  ;;  %v602_v59 = vrot.slane %v598_v54, 1  ;;  %v600_v60 = vmax.f32 %v2135_v38, %v591_v55  ;;  %v2251_v38 = vld [vmem:[%s2928_s10] sm:$0xff]  }
 0x262   :  { %v608_v61 = vsel %vm157_vm3, %v602_v59, %v603_v58  ;;  %v604_v62 = vrot.slane %v600_v60, 1  ;;  %v609_v63 = vsel %vm157_vm3, %v605_v57, %v602_v59 }
 0x263   :  { %v610_v0 = vmax.f32 %v598_v54, %v608_v61  ;;  %v613_v1 = vmax.f32 %v601_v50, %v609_v63  ;;  %v2247_v61 = vld [vmem:[%s2926_s3 + $0x50] sm:$0xff]   ;;  %v2249_v63 = vld [vmem:[%s2927_s9] sm:$0xff]  }
 0x264   :  { %v606_v2 = vsel %vm157_vm3, %v604_v62, %v605_v57  ;;  %v607_v4 = vsel %vm157_vm3, %v603_v58, %v604_v62  ;;  %v2246_v58 = vld [vmem:[%s2926_s3 + $0x48] sm:$0xff]   ;;  %v2248_v62 = vld [vmem:[%s2926_s3 + $0x58] sm:$0xff]  }
 0x265   :  { %v611_v5 = vmax.f32 %v599_v53, %v607_v4  ;;  %v612_v6 = vmax.f32 %v600_v60, %v606_v2 }
 0x267   :  { %v617_v7 = vpack.c.bf16 %v613_v1, %v612_v6  ;;  %v616_v8 = vpack.c.bf16 %v611_v5, %v610_v0 }
 0x269   :  { %2138 = vmatpush3.bf16.msra.mxu0 %v616_v8 }
 0x26a   :  { %2139 = vmatprep.subr.bf16.mxu0 %v2304_v44 }
 0x26d   :  { %2140 = vmatpush3.bf16.msra.mxu0 %v617_v7 }
 0x26e   :  { %2157 = vmatprep.subr.bf16.mxu0 %v2304_v44 }
 0x270   :  { %2142 = vmatmul.mubr.msk.bf16.vlgmr.msra.gmra.mrb[4].mxu0 %vm623_vm8, %v2236_v9 }
 0x271   :  { %2158 = vmatpush3.bf16.msra.mxu0 %v2239_v10  ;;  %2165 = vmatprep.mubr.msk.bf16.mxu0 %vm2305_vm7, %v2304_v44 }
 0x272   :  { %2159 = vmatprep.subr.bf16.mxu0 %v2304_v44 }
 0x275   :  { %2160 = vmatpush3.bf16.msra.mxu0 %v2241_v11 }
 0x276   :  { %2161 = vmatprep.subr.bf16.mxu0 %v2304_v44 }
 0x279   :  { %2162 = vmatpush3.bf16.msra.mxu0 %v2243_v13 }
 0x27a   :  { %2163 = vmatprep.subr.bf16.mxu0 %v2304_v44 }
 0x27d   :  { %2164 = vmatpush3.bf16.msra.mxu0 %v2245_v15 }
 0x343   :  { %v661_v18 = vpop.f32.mrb[4].mxu0 }
 0x344   :  { %v2143_v19 = vpop.f32.mrb[5].mxu0  ;;  %v668_v22 = vrot.slane %v661_v18, 7  ;;  %v678_v43 = vrot.slane %v661_v18, 1 }
 0x345   :  { %v664_v25 = vpop.f32.mrb[6].mxu0 }
 0x346   :  { %v669_v45 = vrot.slane %v664_v25, 7  ;;  %v679_v46 = vrot.slane %v664_v25, 1  ;;  %v697_v47 = vpack.c.bf16 %v664_v25, %v661_v18  ;;  %v2144_v48 = vpop.f32.mrb[7].mxu0  ;;  %v2253_v25 = vld [vmem:[%s2928_s10 + $0x10] sm:$0xff]  }
 0x347   :  { %v2259_v48 = vld [vmem:[%s2930_s5 + $0x88] sm:$0xff]  }
 0x348   :  { %v670_v49 = vsel %vm136_vm1, %v668_v22, %v669_v45  ;;  %v671_v50 = vsel %vm136_vm1, %v669_v45, %v668_v22  ;;  %v680_v51 = vsel %vm157_vm3, %v678_v43, %v679_v46  ;;  %v681_v52 = vsel %vm157_vm3, %v679_v46, %v678_v43  ;;  %2154 = vmatmul.mubr.msk.bf16.vlgmr.msra.gmra.mrb[4].mxu1 %vm219_vm0, %v697_v47  ;;  %v2255_v43 = vld [vmem:[%s2930_s5 + $0xc0] sm:$0xff]   ;;  %v2257_v46 = vld [vmem:[%s2930_s5 + $0xc8] sm:$0xff]  }
 0x349   :  { %v676_v53 = vsel %vm2619_vm9, %v671_v50, 0.0  ;;  %v677_v54 = vsel %vm2623_vm10, %v670_v49, 0.0  ;;  %v686_v55 = vsel %vm2627_vm11, %v680_v51, 0.0  ;;  %v687_v57 = vsel %vm2631_vm12, %v681_v52, 0.0  ;;  %2170 = vmatpush3.bf16.msra.mxu1 %v2244_v42  ;;  %2177 = vmatprep.mubr.msk.bf16.mxu1 %vm2305_vm7, %v2304_v44  ;;  %v2254_v42 = vld [vmem:[%s2928_s10 + $0x18] sm:$0xff]   ;;  %v2256_v45 = vld [vmem:[%s2930_s5 + $0x80] sm:$0xff]  }
 0x34a   :  { %v688_v59 = vpack.c.bf16 %v677_v54, %v676_v53  ;;  %v843_v60 = vpack.c.bf16 %v687_v57, %v686_v55  ;;  %2171 = vmatprep.subr.bf16.mxu1 %v2304_v44  ;;  %v2258_v47 = vld [vmem:[%s2930_s5 + $0x40] sm:$0xff]   ;;  %v2261_v49 = vld [vmem:[%s2930_s5 + $0xd0] sm:$0xff]   ;;  %v2265_v51 = vld [vmem:[%s2930_s5 + $0xd8] sm:$0xff]  }
 0x34b   :  { %v2263_v50 = vld [vmem:[%s2930_s5 + $0x90] sm:$0xff]   ;;  %v2267_v52 = vld [vmem:[%s2930_s5 + $0x98] sm:$0xff]   ;;  %v2269_v53 = vld [vmem:[%s2930_s5 + $0xe0] sm:$0xff]  }
 0x34c   :  { %2166 = vmatmul.mubr.msk.bf16.vlgmr.msra.gmra.mrb[8].mxu0 %vm219_vm0, %v688_v59  ;;  %v2271_v54 = vld [vmem:[%s2930_s5 + $0xa0] sm:$0xff]   ;;  %v2273_v55 = vld [vmem:[%s2930_s5 + $0xe8] sm:$0xff]   ;;  %v2279_v59 = vld [vmem:[%s2930_s5 + $0xb0] sm:$0xff]  }
 0x34d   :  { %2172 = vmatpush3.bf16.msra.mxu1 %v2246_v58  ;;  %2183 = vmatprep.mubr.msk.bf16.mxu0 %vm949_vm13, %v2249_v63  ;;  %v2275_v57 = vld [vmem:[%s2930_s5 + $0xa8] sm:$0xff]   ;;  %v2277_v58 = vld [vmem:[%s2930_s5 + $0xf0] sm:$0xff]  }
 0x34e   :  { %2173 = vmatprep.subr.bf16.mxu1 %v2304_v44 }
 0x351   :  { %2174 = vmatpush3.bf16.msra.mxu1 %v2247_v61 }
 0x352   :  { %2175 = vmatprep.subr.bf16.mxu1 %v2304_v44 }
 0x355   :  { %2176 = vmatpush3.bf16.msra.mxu1 %v2248_v62 }
 0x356   :  { %1997 = vmatprep.subr.bf16.mxu1 %v2255_v43 }
 0x358   :  { %2178 = vmatmul.mubr.msk.bf16.vlgmr.msra.gmra.mrb[8].mxu1 %vm219_vm0, %v843_v60 }
 0x359   :  { %1347 = vmatprep.mubr.bf16.mxu1 %v2521_v23  ;;  %v1794_v23 = vld [vmem:[%s2929_s4] ss:$0 sm:$0xff]  ;;  %1998 = vmatpush3.bf16.msra.mxu1 %v2256_v45 }
 0x35a   :  { %1999 = vmatprep.subr.bf16.mxu1 %v2257_v46  ;;  %v2288_v45 = vld [vmem:[%s2930_s5 + $0x100] sm:$0xff]  }
 0x35d   :  { %2000 = vmatpush3.bf16.msra.mxu1 %v2259_v48 }
 0x35e   :  { %2001 = vmatprep.subr.bf16.mxu1 %v2261_v49  ;;  %v2289_v49 = vld [vmem:[%s2930_s5 + $0x148] sm:$0xff]  }
 0x361   :  { %2002 = vmatpush3.bf16.msra.mxu1 %v2263_v50 }
 0x362   :  { %2003 = vmatprep.subr.bf16.mxu1 %v2265_v51 }
 0x365   :  { %2004 = vmatpush3.bf16.msra.mxu1 %v2267_v52 }
 0x366   :  { %2005 = vmatprep.subr.bf16.mxu1 %v2269_v53 }
 0x369   :  { %2006 = vmatpush3.bf16.msra.mxu1 %v2271_v54 }
 0x36a   :  { %2007 = vmatprep.subr.bf16.mxu1 %v2273_v55 }
 0x36d   :  { %2008 = vmatpush3.bf16.msra.mxu1 %v2275_v57 }
 0x36e   :  { %2009 = vmatprep.subr.bf16.mxu1 %v2277_v58 }
 0x371   :  { %2010 = vmatpush3.bf16.msra.mxu1 %v2279_v59 }
 0x41b   :  { %v768_v0 = vpop.f32.mrb[4].mxu1 }
 0x41c   :  { %v2155_v1 = vpop.f32.mrb[5].mxu1 }
 0x41d   :  { %v771_v2 = vpop.f32.mrb[6].mxu1 }
 0x41e   :  { %v2156_v4 = vpop.f32.mrb[7].mxu1 }
 0x41f   :  { %v836_v5 = vpop.f32.mrb[8].mxu0  ;;  %v2302_v4 = vld [vmem:[%s2930_s5 + $0x138] sm:$0xff]  }
 0x420   :  { %v837_v6 = vadd.f32 %v836_v5, %v768_v0  ;;  %v2167_v7 = vpop.f32.mrb[9].mxu0  ;;  %v2262_v5 = vld [vmem:[%s2930_s5 + $0x48] sm:$0xff]  }
 0x421   :  { %v839_v44 = vpop.f32.mrb[10].mxu0  ;;  %v2268_v7 = vld [vmem:[%s2930_s5 + $0x10] sm:$0xff]  }
 0x422   :  { %v840_v8 = vadd.f32 %v839_v44, %v771_v2  ;;  %v2168_v9 = vpop.f32.mrb[11].mxu0  ;;  %v2260_v2 = vld [vmem:[%s2930_s5] sm:$0xff]  }
 0x423   :  { %v2276_v44 = vld [vmem:[%s2930_s5 + $0x20] sm:$0xff]   ;;  %v2280_v9 = vld [vmem:[%s2930_s5 + $0x28] sm:$0xff]  }
 0x42b   :  { %v914_v10 = vpop.f32.mrb[8].mxu1 }
 0x42c   :  { %v921_v11 = vadd.f32 %v914_v10, %v837_v6  ;;  %v2179_v12 = vpop.f32.mrb[9].mxu1  ;;  %v2266_v6 = vld [vmem:[%s2930_s5 + $0x50] sm:$0xff]   ;;  %v2281_v10 = vld [vmem:[%s2930_s5 + $0xf8] sm:$0xff]  }
 0x42d   :  { %v917_v13 = vpop.f32.mrb[10].mxu1  ;;  %v2284_v12 = vld [vmem:[%s2930_s5 + $0x30] sm:$0xff]   ;;  %2011 = vmatprep.subr.bf16.mxu1 %v2281_v10 }
 0x42e   :  { %v930_v15 = vadd.f32 %v1794_v23, %v921_v11  ;;  %v922_v16 = vadd.f32 %v917_v13, %v840_v8  ;;  %v2180_v17 = vpop.f32.mrb[11].mxu1  ;;  %v2278_v8 = vld [vmem:[%s2930_s5 + $0x68] sm:$0xff]   ;;  %v2283_v11 = vld [vmem:[%s2930_s5 + $0xb8] sm:$0xff]  }
 0x42f   :  { %2012 = vmatpush3.bf16.msra.mxu1 %v2283_v11  ;;  %v2285_v13 = vld [vmem:[%s2930_s5 + $0x78] sm:$0xff]  }
 0x430   :  { %v931_v18 = vadd.f32 %v1794_v23, %v922_v16  ;;  %v932_v19 = vmax.f32 %v930_v15, 0.0  ;;  %v2282_v23 = vld [vmem:[%s2930_s5 + $0x70] sm:$0xff]   ;;  %v2286_v15 = vld [vmem:[%s2930_s5 + $0x140] sm:$0xff]   ;;  %v2287_v16 = vld [vmem:[%s2930_s5 + $0x38] sm:$0xff]  }
 0x431   :  { %2053 = vmatprep.subr.bf16.mxu1 %v2286_v15 }
 0x432   :  { %v933_v21 = vmax.f32 %v931_v18, 0.0 }
 0x434   :  { %v938_v22 = vpack.c.bf16 %v933_v21, %v932_v19 }
 0x436   :  { %2181 = vmatprep.subr.bf16.mxu0 %v938_v22 }
 0x437   :  { %2182 = vmatpush3.bf16.msra.mxu0 %v938_v22 }
 0x438   :  { %2187 = vmatprep.subr.bf16.mxu0 %v2251_v38 }
 0x43a   :  { %2184 = vmatmul.mubr.msk.bf16.vlgmr.msra.gmra.mrb[12].mxu0 %vm949_vm13, %v2250_v40 }
 0x43b   :  { %2188 = vmatpush3.bf16.msra.mxu0 %v2251_v38 }
 0x43c   :  { %2189 = vmatprep.subr.bf16.mxu0 %v2252_v41 }
 0x43f   :  { %2190 = vmatpush3.bf16.msra.mxu0 %v2252_v41 }
 0x440   :  { %2191 = vmatprep.subr.bf16.mxu0 %v2253_v25 }
 0x443   :  { %2192 = vmatpush3.bf16.msra.mxu0 %v2253_v25 }
 0x444   :  { %2193 = vmatprep.subr.bf16.mxu0 %v2254_v42 }
 0x447   :  { %2194 = vmatpush3.bf16.msra.mxu0 %v2254_v42 }
 0x448   :  { %2025 = vmatprep.subr.bf16.mxu0 %v2258_v47 }
 0x50d   :  { %v2185_v60 = vpop.f32.mrb[12].mxu0 }
 0x50e   :  { %v990_v61 = vpop.f32.mrb[13].mxu0 }
 0x50f   :  { %v2186_v62 = vpop.f32.mrb[14].mxu0 }
 0x510   :  { %v1006_v63 = vpack.c.bf16 %v2186_v62, %v2185_v60  ;;  %v993_v0 = vpop.f32.mrb[15].mxu0  ;;  %v2290_v62 = vld [vmem:[%s2930_s5 + $0x108] sm:$0xff]  }
 0x511   :  { %v1005_v1 = vpack.c.bf16 %v993_v0, %v990_v61 }
 0x513   :  { %2195 = vmatprep.mubr.msk.bf16.mxu0 %vm219_vm0, %v1005_v1  ;;  %v2300_v1 = vld [vmem:[%s2930_s5 + $0x130] sm:$0xff]  }
 0x514   :  { %2196 = vmatmul.mubr.msk.bf16.vlgmr.msra.gmra.mrb[16].mxu0 %vm219_vm0, %v1006_v63  ;;  %vm2834_vm0 = vmpackc.low %vm2306_vm14, %vm2457_vm4 }
 0x515   :  { %1871 = vmatprep.mubr.msk.bf16.mxu0 %vm2746_vm15, %v1870_v33  ;;  %2026 = vmatpush3.bf16.msra.mxu0 %v2260_v2  ;;  %v2274_v33 = vld [vmem:[%s2930_s5 + $0x60] sm:$0xff]   ;;  %v2301_v2 = vld [vmem:[%s2930_s5 + $0x178] sm:$0xff]  }
 0x516   :  { %2027 = vmatprep.subr.bf16.mxu0 %v2262_v5 }
 0x519   :  { %2028 = vmatpush3.bf16.msra.mxu0 %v2264_v14 }
 0x51a   :  { %2029 = vmatprep.subr.bf16.mxu0 %v2266_v6 }
 0x51d   :  { %2030 = vmatpush3.bf16.msra.mxu0 %v2268_v7 }
 0x51e   :  { %2031 = vmatprep.subr.bf16.mxu0 %v2270_v24 }
 0x521   :  { %2032 = vmatpush3.bf16.msra.mxu0 %v2272_v29 }
 0x522   :  { %2033 = vmatprep.subr.bf16.mxu0 %v2274_v33 }
 0x525   :  { %2034 = vmatpush3.bf16.msra.mxu0 %v2276_v44 }
 0x526   :  { %2035 = vmatprep.subr.bf16.mxu0 %v2278_v8 }
 0x529   :  { %2036 = vmatpush3.bf16.msra.mxu0 %v2280_v9 }
 0x52a   :  { %2037 = vmatprep.subr.bf16.mxu0 %v2282_v23 }
 0x52d   :  { %2038 = vmatpush3.bf16.msra.mxu0 %v2284_v12 }
 0x52e   :  { %2039 = vmatprep.subr.bf16.mxu0 %v2285_v13 }
 0x531   :  { %2040 = vmatpush3.bf16.msra.mxu0 %v2287_v16 }
 0x5e7   :  { %v2197_v17 = vpop.f32.mrb[16].mxu0 }
 0x5e8   :  { %v1079_v18 = vpop.f32.mrb[17].mxu0  ;;  %v1102_v19 = vrot.slane %v2197_v17, 7  ;;  %v1126_v40 = vrot.slane %v2197_v17, 1 }
 0x5e9   :  { %v1098_v21 = vrot.slane %v1079_v18, 7  ;;  %v1122_v22 = vrot.slane %v1079_v18, 1  ;;  %v2198_v38 = vpop.f32.mrb[18].mxu0 }
 0x5ea   :  { %v1104_v41 = vrot.slane %v2198_v38, 7  ;;  %v1128_v25 = vrot.slane %v2198_v38, 1  ;;  %v1184_v42 = vpack.c.bf16 %v2198_v38, %v2197_v17  ;;  %v1082_v43 = vpop.f32.mrb[19].mxu0 }
 0x5eb   :  { %v1100_v46 = vrot.slane %v1082_v43, 7  ;;  %v1124_v47 = vrot.slane %v1082_v43, 1  ;;  %v1182_v48 = vpack.c.bf16 %v1082_v43, %v1079_v18 }
 0x5ec   :  { %v1106_v50 = vsel %vm136_vm1, %v1102_v19, %v1104_v41  ;;  %v1112_v51 = vsel %vm136_vm1, %v1104_v41, %v1098_v21  ;;  %v1130_v52 = vsel %vm157_vm3, %v1126_v40, %v1128_v25  ;;  %v1136_v53 = vsel %vm157_vm3, %v1128_v25, %v1122_v22 }
 0x5ed   :  { %v1108_v54 = vsel %vm136_vm1, %v1100_v46, %v1102_v19  ;;  %v1110_v55 = vsel %vm136_vm1, %v1098_v21, %v1100_v46  ;;  %v1132_v57 = vsel %vm157_vm3, %v1124_v47, %v1126_v40  ;;  %v1134_v58 = vsel %vm157_vm3, %v1122_v22, %v1124_v47  ;;  %1348 = vmatmul.mubr.bf16.vlgmr.msra.gmra.mrb[12].mxu1 %v1182_v48  ;;  %vm2857_vm1 = vmpackc.low %vm2463_vm5, %vm2306_vm14 }
 0x5ee   :  { %v1873_v59 = vpack.c.bf16 %v1110_v55, %v1112_v51  ;;  %v1933_v60 = vpack.c.bf16 %v1132_v57, %v1134_v58  ;;  %2054 = vmatpush3.bf16.msra.mxu1 %v2288_v45  ;;  %1355 = vmatprep.mubr.bf16.mxu1 %v2519_v20  ;;  %v1879_v63 = vpack.c.bf16 %v1106_v50, %v1108_v54  ;;  %v1941_v45 = vld [vmem:[%s2931_s6] ss:$0 sm:$0xff] }
 0x5ef   :  { %2055 = vmatprep.subr.bf16.mxu1 %v2289_v49  ;;  %v1939_v0 = vpack.c.bf16 %v1136_v53, %v1130_v52 }
 0x5f0   :  { %1874 = vmatmul.mubr.msk.bf16.vlgmr.msra.gmra.mrb[20].mxu0 %vm2746_vm15, %v1873_v59 }
 0x5f1   :  { %1877 = vmatprep.mubr.msk.bf16.mxu0 %vm2834_vm0, %v1876_v34  ;;  %v2298_v34 = vld [vmem:[%s2930_s5 + $0x128] sm:$0xff]  }
 0x5f2   :  { %2056 = vmatpush3.bf16.msra.mxu1 %v2290_v62 }
 0x5f3   :  { %2057 = vmatprep.subr.bf16.mxu1 %v2291_v3 }
 0x5f5   :  { %1356 = vmatmul.mubr.bf16.gmra.mrb[16].mxu1 %v1184_v42 }
 0x5f6   :  { %2058 = vmatpush3.bf16.msra.mxu1 %v2292_v37  ;;  %1931 = vmatprep.mubr.msk.bf16.mxu1 %vm2857_vm1, %v1930_v35  ;;  %v2299_v35 = vld [vmem:[%s2930_s5 + $0x170] sm:$0xff]  }
 0x5f7   :  { %2059 = vmatprep.subr.bf16.mxu1 %v2293_v26 }
 0x5f8   :  { %1880 = vmatmul.mubr.msk.bf16.gmra.mrb[24].mxu0 %vm2834_vm0, %v1879_v63 }
 0x5fa   :  { %2060 = vmatpush3.bf16.msra.mxu1 %v2294_v39 }
 0x5fb   :  { %2061 = vmatprep.subr.bf16.mxu1 %v2295_v30 }
 0x5fe   :  { %2062 = vmatpush3.bf16.msra.mxu1 %v2296_v31 }
 0x5ff   :  { %2063 = vmatprep.subr.bf16.mxu1 %v2297_v32 }
 0x602   :  { %2064 = vmatpush3.bf16.msra.mxu1 %v2298_v34 }
 0x603   :  { %2065 = vmatprep.subr.bf16.mxu1 %v2299_v35 }
 0x606   :  { %2066 = vmatpush3.bf16.msra.mxu1 %v2300_v1 }
 0x607   :  { %2067 = vmatprep.subr.bf16.mxu1 %v2301_v2 }
 0x60a   :  { %2068 = vmatpush3.bf16.msra.mxu1 %v2302_v4 }
 0x60d   :  { %1934 = vmatmul.mubr.msk.bf16.vlgmr.msra.gmra.mrb[20].mxu1 %vm2857_vm1, %v1933_v60 }
 0x60e   :  { %1937 = vmatprep.mubr.msk.bf16.mxu1 %vm1935_vm2, %v1936_v36 }
 0x615   :  { %1940 = vmatmul.mubr.msk.bf16.gmra.mrb[24].mxu1 %vm1935_vm2, %v1939_v0 }
 0x6c0   :  { %v2013_v5 = vpop.f32.mrb[12].mxu1 }
 0x6c1   :  { %v2014_v14 = vpop.f32.mrb[13].mxu1 }
 0x6c2   :  { %v2015_v6 = vadd.f32 %v2014_v14, %v2013_v5  ;;  %v2016_v7 = vpop.f32.mrb[14].mxu1 }
 0x6c3   :  { %v2017_v24 = vpop.f32.mrb[15].mxu1  ;;  %v2041_v29 = vpop.f32.mrb[20].mxu0 }
 0x6c4   :  { %v2018_v33 = vadd.f32 %v2017_v24, %v2016_v7  ;;  %v2042_v44 = vpop.f32.mrb[21].mxu0 }
 0x6c5   :  { %v2043_v8 = vadd.f32 %v2042_v44, %v2041_v29  ;;  %v2044_v9 = vpop.f32.mrb[22].mxu0 }
 0x6c6   :  { %v2045_v56 = vpop.f32.mrb[23].mxu0 }
 0x6c7   :  { %v1495_v10 = vadd.f32 %v2043_v8, %v2015_v6  ;;  %v2046_v23 = vadd.f32 %v2045_v56, %v2044_v9 }
 0x6c8   :  { %v2019_v11 = vpop.f32.mrb[16].mxu1 }
 0x6c9   :  { %v1498_v12 = vadd.f32 %v2046_v23, %v2018_v33  ;;  %v2020_v13 = vpop.f32.mrb[17].mxu1 }
 0x6ca   :  { %v2021_v15 = vadd.f32 %v2020_v13, %v2019_v11  ;;  %v2022_v27 = vpop.f32.mrb[18].mxu1 }
 0x6cb   :  { %v2023_v28 = vpop.f32.mrb[19].mxu1  ;;  %v2047_v36 = vpop.f32.mrb[24].mxu0 }
 0x6cc   :  { %v2024_v16 = vadd.f32 %v2023_v28, %v2022_v27  ;;  %v2048_v17 = vpop.f32.mrb[25].mxu0 }
 0x6cd   :  { %v2049_v18 = vadd.f32 %v2048_v17, %v2047_v36  ;;  %v2050_v19 = vpop.f32.mrb[26].mxu0 }
 0x6ce   :  { %v2051_v21 = vpop.f32.mrb[27].mxu0 }
 0x6cf   :  { %v1503_v22 = vadd.f32 %v2049_v18, %v2021_v15  ;;  %v2052_v38 = vadd.f32 %v2051_v21, %v2050_v19 }
 0x6d1   :  { %v1506_v40 = vadd.f32 %v2052_v38, %v2024_v16 }
 0x6e0   :  { %v2069_v41 = vpop.f32.mrb[20].mxu1 }
 0x6e1   :  { %v2070_v25 = vpop.f32.mrb[21].mxu1 }
 0x6e2   :  { %v2071_v42 = vadd.f32 %v2070_v25, %v2069_v41  ;;  %v2072_v43 = vpop.f32.mrb[22].mxu1 }
 0x6e3   :  { %v2073_v46 = vpop.f32.mrb[23].mxu1 }
 0x6e4   :  { %v1691_v47 = vadd.f32 %v2071_v42, %v1495_v10  ;;  %v2074_v48 = vadd.f32 %v2073_v46, %v2072_v43 }
 0x6e6   :  { %v1702_v49 = vadd.f32 %v1941_v45, %v1691_v47  ;;  %v1692_v50 = vadd.f32 %v2074_v48, %v1498_v12 }
 0x6e8   :  { %v1706_v51 = vmax.f32 %v1702_v49, 0.0  ;;  %v1703_v52 = vadd.f32 %v1941_v45, %v1692_v50  ;;  %v2075_v53 = vpop.f32.mrb[24].mxu1 }
 0x6e9   :  { %v2076_v54 = vpop.f32.mrb[25].mxu1 }
 0x6ea   :  { %1710 = vst [vmem:[%s2932_s11] sm:$0xff] %v1706_v51  ;;  %v1707_v55 = vmax.f32 %v1703_v52, 0.0  ;;  %v2077_v57 = vadd.f32 %v2076_v54, %v2075_v53  ;;  %v2078_v58 = vpop.f32.mrb[26].mxu1 }
 0x6eb   :  { %v2079_v59 = vpop.f32.mrb[27].mxu1 }
 0x6ec   :  { %1711 = vst [vmem:[%s2932_s11 + $0x8] sm:$0xff] %v1707_v55  ;;  %v1693_v60 = vadd.f32 %v2077_v57, %v1503_v22  ;;  %v2080_v61 = vadd.f32 %v2079_v59, %v2078_v58 }
 0x6ee   :  { %v1704_v62 = vadd.f32 %v1941_v45, %v1693_v60  ;;  %v1694_v63 = vadd.f32 %v2080_v61, %v1506_v40 }
 0x6f0   :  { %v1708_v3 = vmax.f32 %v1704_v62, 0.0  ;;  %v1705_v0 = vadd.f32 %v1941_v45, %v1694_v63 }
 0x6f2   :  { %1712 = vst [vmem:[%s2932_s11 + $0x10] sm:$0xff] %v1708_v3  ;;  %v1709_v37 = vmax.f32 %v1705_v0, 0.0 }
 0x6f4   :  { %1713 = vst [vmem:[%s2932_s11 + $0x18] sm:$0xff] %v1709_v37 }

</bundles_post_ra>
